<compile_context>
chip_gen: v6e
topology: v6e:2x2x1
jax: 0.10.0
libtpu: 0.0.40
codegen_flags: <defaults>
</compile_context>

<pallas_src>
import functools

import jax
import jax.numpy as jnp
from jax.experimental import pallas as pl
from jax.experimental.pallas import tpu as pltpu

_MIB = 1024 * 1024


# --------------------------------------------------------------------------
# Hardware / sizing helpers
# --------------------------------------------------------------------------
def _round_up(x, m):
    return ((x + m - 1) // m) * m


def _sublane_multiple(dtype):
    itemsize = jnp.dtype(dtype).itemsize
    return {8: 4, 4: 8, 2: 16, 1: 32}.get(itemsize, 8)


@functools.lru_cache(maxsize=None)
def _tpu_vmem_capacity_bytes():
    """Physical VMEM per TensorCore; conservative fallback if unqueryable."""
    try:
        info = pltpu.get_tpu_info()
        v = getattr(info, "vmem_capacity_bytes", None)
        if isinstance(v, int) and v > 0:
            return v
    except Exception:
        pass
    return 64 * _MIB  # v7x per-TC size; v5e/v6e actually have 128 MiB


@functools.lru_cache(maxsize=None)
def _num_tensorcores_per_chip():
    """Best-effort TensorCore count (2 on v7x, 1 on v5e/v6e). Defaults to 1."""
    try:
        info = pltpu.get_tpu_info()
        for attr in ("num_cores", "tensorcore_count", "num_tensorcores",
                     "cores_per_chip"):
            v = getattr(info, attr, None)
            if isinstance(v, int) and v > 0:
                return v
    except Exception:
        pass
    try:
        dev = jax.local_devices()[0]
        for attr in ("num_cores", "core_count"):
            v = getattr(dev, attr, None)
            if isinstance(v, int) and v > 0:
                return v
    except Exception:
        pass
    return 1


def _vmem_data_budget_bytes():
    """Budget for double-buffered (in + out) blocks; leaves compiler headroom."""
    cap = _tpu_vmem_capacity_bytes()
    return max(8 * _MIB, min(cap - 16 * _MIB, 64 * _MIB))


def _flat_block_bytes(tb, C, HW, in_dtype, out_dtype):
    """Padded VMEM bytes of one (1, tb, C*HW) input and (1, C, tb, HW) output block."""
    sub_in = _sublane_multiple(in_dtype)
    sub_out = _sublane_multiple(out_dtype)
    in_b = _round_up(tb, sub_in) * _round_up(C * HW, 128) * jnp.dtype(in_dtype).itemsize
    out_b = C * _round_up(tb, sub_out) * _round_up(HW, 128) * jnp.dtype(out_dtype).itemsize
    return in_b, out_b


def _frame_block_bytes(tb, C, H, W, in_dtype, out_dtype):
    """Padded VMEM bytes of one (1, tb, C, H, W) input and (1, C, tb, H, W) output block."""
    sub_in = _sublane_multiple(in_dtype)
    sub_out = _sublane_multiple(out_dtype)
    in_b = tb * C * _round_up(H, sub_in) * _round_up(W, 128) * jnp.dtype(in_dtype).itemsize
    out_b = C * tb * _round_up(H, sub_out) * _round_up(W, 128) * jnp.dtype(out_dtype).itemsize
    return in_b, out_b


def _pick_tiling(T, C, H, W, in_dtype, out_dtype, budget, block_t=None):
    """Return (mode, tb) with mode in {"flat", "frames"}."""
    HW = H * W
    sub_req = max(_sublane_multiple(in_dtype), _sublane_multiple(out_dtype))
    flat_allowed = (HW % 128) == 0  # channel boundaries stay lane-tile aligned

    def flat_fits(tb):
        i, o = _flat_block_bytes(tb, C, HW, in_dtype, out_dtype)
        return 2 * (i + o) <= budget

    def frames_fits(tb):
        i, o = _frame_block_bytes(tb, C, H, W, in_dtype, out_dtype)
        return 2 * (i + o) <= budget

    if block_t is not None:
        tb = max(1, min(int(block_t), T))
        while tb > 1 and not frames_fits(tb):   # clamp to the VMEM budget
            tb -= 1
        if flat_allowed and (tb == T or tb % sub_req == 0) and flat_fits(tb):
            return "flat", tb
        return "frames", tb

    # Preferred: lane-dense flattened layout (tb == T or a multiple of sub_req).
    if flat_allowed:
        if flat_fits(T):
            return "flat", T
        tb_max = 0
        cand = (T // sub_req) * sub_req
        while cand >= sub_req:
            if flat_fits(cand):
                tb_max = cand
                break
            cand -= sub_req
        if tb_max:
            div = next((d for d in range(tb_max, sub_req - 1, -sub_req)
                        if T % d == 0), 0)
            return "flat", (div if div and div * 2 >= tb_max else tb_max)

    # Fallback: frame-wise layout ((H, W) stay the last two block dims; any tb ok).
    if frames_fits(T):
        return "frames", T
    tb_max = T
    while tb_max > 1 and not frames_fits(tb_max):
        tb_max -= 1
    div = next((d for d in range(tb_max, 0, -1) if T % d == 0), 1)
    return "frames", (div if div * 2 >= tb_max else tb_max)


# --------------------------------------------------------------------------
# Kernels
# --------------------------------------------------------------------------
def _norm_permute_flat_kernel(scale_ref, bias_ref, x_ref, o_ref, *,
                              num_channels, frame_elems):
    """Lane-dense layout.

    scale_ref / bias_ref : SMEM (C,) float32 scalar-prefetch buffers
    x_ref                : VMEM (1, tb, C*H*W) slice of the (B, T, C*H*W) input
    o_ref                : VMEM (1, C, tb, H*W) slice of the (B, C, T, H*W) output
    """
    for c in range(num_channels):
        xc = x_ref[0, :, c * frame_elems:(c + 1) * frame_elems]   # (tb, H*W)
        o_ref[0, c, :, :] = (xc * scale_ref[c] + bias_ref[c]).astype(o_ref.dtype)


def _norm_permute_frames_kernel(scale_ref, bias_ref, x_ref, o_ref, *, num_channels):
    """Frame-wise layout (safe for any H, W).

    x_ref : VMEM (1, tb, C, H, W) slice of the (B, T, C, H, W) input
    o_ref : VMEM (1, C, tb, H, W) slice of the (B, C, T, H, W) output
    """
    for c in range(num_channels):
        xc = x_ref[0, :, c, :, :]                                  # (tb, H, W)
        o_ref[0, c, :, :, :] = (xc * scale_ref[c] + bias_ref[c]).astype(o_ref.dtype)


# --------------------------------------------------------------------------
# Wrapper
# --------------------------------------------------------------------------
def normalize_and_permute(videos, scale, bias, *, block_t=None, out_dtype=None):
    """(B, T, C, H, W) -> (B, C, T, H, W), normalized per channel.

    Computes transpose(0,2,1,3,4) of (videos - mean) / std, with
    scale = 1/std and bias = -mean/std precomputed (fused multiply-add).
    """
    B, T, C, H, W = videos.shape
    assert scale.shape == (C,) and bias.shape == (C,)
    in_dtype = jnp.dtype(videos.dtype)
    out_dtype = in_dtype if out_dtype is None else jnp.dtype(out_dtype)
    HW = H * W

    budget = _vmem_data_budget_bytes()
    mode, tb = _pick_tiling(T, C, H, W, in_dtype, out_dtype, budget, block_t=block_t)
    n_t = pl.cdiv(T, tb)
    grid = (B, n_t)

    if mode == "flat":
        x = videos.reshape(B, T, C * HW)
        kernel = functools.partial(_norm_permute_flat_kernel,
                                   num_channels=C, frame_elems=HW)
        in_spec = pl.BlockSpec((1, tb, C * HW),
                               lambda b, t, scale_r, bias_r: (b, t, 0))
        out_spec = pl.BlockSpec((1, C, tb, HW),
                                lambda b, t, scale_r, bias_r: (b, 0, t, 0))
        out_shape = jax.ShapeDtypeStruct((B, C, T, HW), out_dtype)
        in_block, out_block = _flat_block_bytes(tb, C, HW, in_dtype, out_dtype)
    else:
        x = videos
        kernel = functools.partial(_norm_permute_frames_kernel, num_channels=C)
        in_spec = pl.BlockSpec((1, tb, C, H, W),
                               lambda b, t, scale_r, bias_r: (b, t, 0, 0, 0))
        out_spec = pl.BlockSpec((1, C, tb, H, W),
                                lambda b, t, scale_r, bias_r: (b, 0, t, 0, 0))
        out_shape = jax.ShapeDtypeStruct((B, C, T, H, W), out_dtype)
        in_block, out_block = _frame_block_bytes(tb, C, H, W, in_dtype, out_dtype)

    # vmem limit derived from the actual double-buffered block footprint.
    vmem_cap = _tpu_vmem_capacity_bytes()
    vmem_limit = int(min(vmem_cap, max(16 * _MIB, 2 * (in_block + out_block) + 4 * _MIB)))

    grid_spec = pltpu.PrefetchScalarGridSpec(
        num_scalar_prefetch=2,          # scale, bias -> SMEM
        grid=grid,
        in_specs=[in_spec],
        out_specs=out_spec,
    )

    def _run(dim_semantics):
        return pl.pallas_call(
            kernel,
            out_shape=out_shape,
            grid_spec=grid_spec,
            compiler_params=pltpu.CompilerParams(
                dimension_semantics=dim_semantics,
                vmem_limit_bytes=vmem_limit),
        )(scale, bias, x)

    out = None
    if B >= 2 and _num_tensorcores_per_chip() >= 2:
        # v7x: explicitly shard the batch axis across the two TensorCores.
        try:
            out = _run((pltpu.CORE_PARALLEL, pltpu.PARALLEL))
        except Exception:
            out = None
    if out is None:
        out = _run(("parallel", "parallel"))

    if mode == "flat":
        out = out.reshape(B, C, T, H, W)
    return out


# --------------------------------------------------------------------------
# Module port
# --------------------------------------------------------------------------
class BackboneEncoderDecoderEncoderLossPallas:
    """JAX/Pallas port of the concrete parts of BackboneEncoderDecoder_EncoderLoss."""

    def __init__(self,
                 pixel_mean=(0.485, 0.456, 0.406),
                 pixel_std=(0.229, 0.224, 0.225)):
        # registered buffers (deterministic, no checkpoint load)
        self.pixel_mean = jnp.asarray(pixel_mean, dtype=jnp.float32)
        self.pixel_std = jnp.asarray(pixel_std, dtype=jnp.float32)
        # fused multiply-add form of (x - mean) / std  ==  x * scale + bias
        self.pixel_scale = 1.0 / self.pixel_std
        self.pixel_bias = -self.pixel_mean / self.pixel_std
        # TODO(synk): self.video_backbone / self.fusion_encoder / self.decoder are
        #             built from external registries and are not defined in-module.

    def preprocess(self, videos, *, block_t=None, out_dtype=None):
        """Forward-pass preprocessing: normalize + permute(0, 2, 1, 3, 4)."""
        return normalize_and_permute(videos, self.pixel_scale, self.pixel_bias,
                                     block_t=block_t, out_dtype=out_dtype)

    def forward(self, batch_dict):
        videos = batch_dict['video_dict']['videos']          # (B, T, C, H, W)
        normalized_ncthw = self.preprocess(videos)           # (B, C, T, H, W)
        # TODO(synk): model_preds / fusion_encoder.compute_loss / decoder.compute_loss
        #             require the registry-defined sub-modules; only the in-module
        #             compute (normalization + permute) is implemented.
        return normalized_ncthw


if __name__ == "__main__":
    key = jax.random.PRNGKey(0)
    B, T, C, H, W = 2, 16, 3, 16, 16
    videos = jax.random.uniform(key, (B, T, C, H, W), dtype=jnp.float32)

    model = BackboneEncoderDecoderEncoderLossPallas()
    batch_dict = {'video_dict': {'videos': videos}}

    # pure-JAX reference:  (x - mean) / std, then permute(0, 2, 1, 3, 4)
    mean = model.pixel_mean.reshape(1, 1, C, 1, 1)
    std = model.pixel_std.reshape(1, 1, C, 1, 1)
    ref = jnp.transpose((videos - mean) / std, (0, 2, 1, 3, 4))

    # 1) default path: lane-dense flattened layout, single t-block (tb == T)
    out = jax.block_until_ready(model.forward(batch_dict))
    assert out.shape == (B, C, T, H, W)
    assert jnp.allclose(out, ref, atol=1e-5, rtol=1e-5), "mismatch (default path)"

    # 2) flattened layout with multiple t-blocks (tb == 8 divides T and is a
    #    multiple of the sublane requirement)
    out_flat_blocked = jax.block_until_ready(model.preprocess(videos, block_t=8))
    assert jnp.allclose(out_flat_blocked, ref, atol=1e-5, rtol=1e-5), \
        "mismatch (flat blocked path)"

    # 3) frame-wise fallback layout (tb == 4 is not a sublane multiple -> (H, W) blocks)
    out_frames = jax.block_until_ready(model.preprocess(videos, block_t=4))
    assert jnp.allclose(out_frames, ref, atol=1e-5, rtol=1e-5), \
        "mismatch (frame-wise path)"

    # 4) bf16 output (halves write traffic when the backbone consumes bf16)
    out_bf16 = jax.block_until_ready(model.preprocess(videos, out_dtype=jnp.bfloat16))
    assert out_bf16.dtype == jnp.bfloat16
    assert jnp.allclose(out_bf16.astype(jnp.float32), ref, atol=2e-2, rtol=2e-2), \
        "mismatch (bf16 output path)"

    print("KERNEL_OK")
</pallas_src>

<mosaic_0001>
module attributes {stable_mosaic.version = 11 : i64} {
  func.func @_norm_permute_flat_kernel(%arg0: i32, %arg1: i32, %arg2: memref<3xf32, #tpu.memory_space<smem>>, %arg3: memref<3xf32, #tpu.memory_space<smem>>, %arg4: memref<1x16x768xf32, #tpu.memory_space<vmem>>, %arg5: memref<1x3x16x256xf32, #tpu.memory_space<vmem>>) attributes {dimension_semantics = [#tpu.dimension_semantics<parallel>, #tpu.dimension_semantics<parallel>], iteration_bounds = array<i64: 2, 1>, scalar_prefetch = 2 : i64, scratch_operands = 0 : i64, tpu.core_type = #tpu.core_type<tc>, window_params = [{transform_indices = @transform_0, window_bounds = array<i64: 1, 16, 768>}, {transform_indices = @transform_1, window_bounds = array<i64: 1, 3, 16, 256>}]} {
    %c0 = arith.constant 0 : index
    %c0_0 = arith.constant 0 : index
    %c0_1 = arith.constant 0 : index
    %0 = vector.load %arg4[%c0, %c0_0, %c0_1] : memref<1x16x768xf32, #tpu.memory_space<vmem>>, vector<1x16x256xf32>
    %1 = vector.shape_cast %0 : vector<1x16x256xf32> to vector<16x256xf32>
    %c0_2 = arith.constant 0 : index
    %2 = memref.load %arg2[%c0_2] : memref<3xf32, #tpu.memory_space<smem>>
    %3 = vector.broadcast %2 : f32 to vector<16x256xf32>
    %4 = arith.mulf %1, %3 : vector<16x256xf32>
    %c0_3 = arith.constant 0 : index
    %5 = memref.load %arg3[%c0_3] : memref<3xf32, #tpu.memory_space<smem>>
    %6 = vector.broadcast %5 : f32 to vector<16x256xf32>
    %7 = arith.addf %4, %6 : vector<16x256xf32>
    %c0_4 = arith.constant 0 : index
    %c0_5 = arith.constant 0 : index
    %c0_6 = arith.constant 0 : index
    %c0_7 = arith.constant 0 : index
    %8 = vector.load %arg5[%c0_4, %c0_5, %c0_6, %c0_7] : memref<1x3x16x256xf32, #tpu.memory_space<vmem>>, vector<1x1x16x256xf32>
    %9 = vector.shape_cast %8 : vector<1x1x16x256xf32> to vector<16x256xf32>
    %10 = vector.shape_cast %7 : vector<16x256xf32> to vector<1x1x16x256xf32>
    tpu.vector_store %arg5[%c0_4, %c0_5, %c0_6, %c0_7], %10 {strides = array<i32>} : memref<1x3x16x256xf32, #tpu.memory_space<vmem>>, vector<1x1x16x256xf32>,
    %c0_8 = arith.constant 0 : index
    %c0_9 = arith.constant 0 : index
    %c256 = arith.constant 256 : index
    %11 = vector.load %arg4[%c0_8, %c0_9, %c256] : memref<1x16x768xf32, #tpu.memory_space<vmem>>, vector<1x16x256xf32>
    %12 = vector.shape_cast %11 : vector<1x16x256xf32> to vector<16x256xf32>
    %c1 = arith.constant 1 : index
    %13 = memref.load %arg2[%c1] : memref<3xf32, #tpu.memory_space<smem>>
    %14 = vector.broadcast %13 : f32 to vector<16x256xf32>
    %15 = arith.mulf %12, %14 : vector<16x256xf32>
    %c1_10 = arith.constant 1 : index
    %16 = memref.load %arg3[%c1_10] : memref<3xf32, #tpu.memory_space<smem>>
    %17 = vector.broadcast %16 : f32 to vector<16x256xf32>
    %18 = arith.addf %15, %17 : vector<16x256xf32>
    %c0_11 = arith.constant 0 : index
    %c1_12 = arith.constant 1 : index
    %c0_13 = arith.constant 0 : index
    %c0_14 = arith.constant 0 : index
    %19 = vector.load %arg5[%c0_11, %c1_12, %c0_13, %c0_14] : memref<1x3x16x256xf32, #tpu.memory_space<vmem>>, vector<1x1x16x256xf32>
    %20 = vector.shape_cast %19 : vector<1x1x16x256xf32> to vector<16x256xf32>
    %21 = vector.shape_cast %18 : vector<16x256xf32> to vector<1x1x16x256xf32>
    tpu.vector_store %arg5[%c0_11, %c1_12, %c0_13, %c0_14], %21 {strides = array<i32>} : memref<1x3x16x256xf32, #tpu.memory_space<vmem>>, vector<1x1x16x256xf32>,
    %c0_15 = arith.constant 0 : index
    %c0_16 = arith.constant 0 : index
    %c512 = arith.constant 512 : index
    %22 = vector.load %arg4[%c0_15, %c0_16, %c512] : memref<1x16x768xf32, #tpu.memory_space<vmem>>, vector<1x16x256xf32>
    %23 = vector.shape_cast %22 : vector<1x16x256xf32> to vector<16x256xf32>
    %c2 = arith.constant 2 : index
    %24 = memref.load %arg2[%c2] : memref<3xf32, #tpu.memory_space<smem>>
    %25 = vector.broadcast %24 : f32 to vector<16x256xf32>
    %26 = arith.mulf %23, %25 : vector<16x256xf32>
    %c2_17 = arith.constant 2 : index
    %27 = memref.load %arg3[%c2_17] : memref<3xf32, #tpu.memory_space<smem>>
    %28 = vector.broadcast %27 : f32 to vector<16x256xf32>
    %29 = arith.addf %26, %28 : vector<16x256xf32>
    %c0_18 = arith.constant 0 : index
    %c2_19 = arith.constant 2 : index
    %c0_20 = arith.constant 0 : index
    %c0_21 = arith.constant 0 : index
    %30 = vector.load %arg5[%c0_18, %c2_19, %c0_20, %c0_21] : memref<1x3x16x256xf32, #tpu.memory_space<vmem>>, vector<1x1x16x256xf32>
    %31 = vector.shape_cast %30 : vector<1x1x16x256xf32> to vector<16x256xf32>
    %32 = vector.shape_cast %29 : vector<16x256xf32> to vector<1x1x16x256xf32>
    tpu.vector_store %arg5[%c0_18, %c2_19, %c0_20, %c0_21], %32 {strides = array<i32>} : memref<1x3x16x256xf32, #tpu.memory_space<vmem>>, vector<1x1x16x256xf32>,
    return
  }
  func.func @transform_0(%arg0: i32, %arg1: i32, %arg2: memref<3xf32, #tpu.memory_space<smem>>, %arg3: memref<3xf32, #tpu.memory_space<smem>>) -> (i32, i32, i32) {
    %c0_i32 = arith.constant 0 : i32
    %c0_i32_0 = arith.constant 0 : i32
    return %arg0, %arg1, %c0_i32 : i32, i32, i32
  }
  func.func @transform_1(%arg0: i32, %arg1: i32, %arg2: memref<3xf32, #tpu.memory_space<smem>>, %arg3: memref<3xf32, #tpu.memory_space<smem>>) -> (i32, i32, i32, i32) {
    %c0_i32 = arith.constant 0 : i32
    %c0_i32_0 = arith.constant 0 : i32
    %c0_i32_1 = arith.constant 0 : i32
    return %arg0, %c0_i32, %arg1, %c0_i32_0 : i32, i32, i32, i32
  }
}

</mosaic_0001>

<bundles_post_ra>
// kernel: tpu_custom_call.1
= control target key start
LH: loop header
LB: loop body
LE: loop exit
PB: predicated region body
PF: predicated region fallthrough
CT: control target
= control target key end

     0   :  { %s557_s12 = smov [#allocation3]   ;;  %s761_s0 = inlined_call_operand.hbm [shape: f32[3], index: 0, kind: input, shape index: {}]   ;;  %s762_s2 = inlined_call_operand.hbm [shape: f32[2,16,768], index: 2, kind: input, shape index: {}]   ;;  %s763_s3 = inlined_call_operand.hbm [shape: f32[2,3,16,256], index: 3, kind: output, shape index: {}]   ;;  %s764_s1 = inlined_call_operand.vmem [shape: f32[3], index: 1, kind: input, shape index: {}]  }
   0x1   :  { %9 = dma.hbm_to_smem %s761_s0, 16, %s557_s12, [#allocation2] }
   0x2   :  { %s10_s17 = sshll.u32 %s764_s1, 4  ;;  %s11_s17 = int_to_ptr.vmem [resolvable:$true] %s10_s17 }
   0x3   :  { %s433_s18 = scalar_lea.vmem %s11_s17, 16  ;;  %p438_p1 = scmp.lt.s32.totalorder %s11_s17, %s11_s17 }
   0x4   :  { %p434_p0 = scmp.ne.s32.totalorder %s11_s17, %s433_s18  ;;  %p439_p2 = scmp.lt.s32.totalorder %s433_s18, %s433_s18 }
   0x6   :  { %p440_p3 = por %p439_p2, %p438_p1 }
   0x8   :  { %p441_p4 = pnand %p440_p3, %p434_p0 }
   0xa   :  { %444 = shalt.err (!%p441_p4)  }
   0xb   :  { %s558_s19 = smov [#allocation4]  }
   0xc   :  { %13 = dma.vmem_to_smem %s11_s17, 16, %s558_s19, [#allocation2] }
   0xd   :  { %523 = dma.done.wait [#allocation2], 32 }
   0xe   :  { %524 = vsyncadd [#allocation2], 4294967264 }
   0xf   :  { %15 = sfence }
  0x10   :  { %16 = vsyncpa [#allocation6], 0 }
  0x11   :  { %18 = vsyncpa [#allocation6 + $0x1], 0 }
  0x12   :  { %19 = vsyncpa [#allocation7], 0 }
  0x13   :  { %21 = vsyncpa [#allocation7 + $0x1], 0  ;;  %s591_s0 = smov 0   ;;  %s593_s1 = smov 0  }
  0x14   :  { %s595_s20 = smov 0   ;;  %s597_s21 = smov 0  }
  0x15   :  { %s599_s22 = smov 0   ;;  %s601_s23 = smov 0  }
  0x16 LB: > { %s332_s24 = sadd.s32 4294967295, %s555_s23   ;;  %s333_s25 = sadd.s32 4294967294, %s555_s23   ;;  %s555_s23 = sphi %s601_s23, %s27_s23   ;;  %s551_s22 = sphi %s599_s22, %s775_s22   ;;  %s547_s21 = sphi %s597_s21, %s774_s21   ;;  %s543_s20 = sphi %s595_s20, %s773_s20   ;;  %s539_s1 = sphi %s593_s1, %s772_s1   ;;  %s535_s0 = sphi %s591_s0, %s771_s0  }
  0x17   : > { %s39_s26 = sadd.s32 1, %s551_s22  ;;  %s48_s27 = sadd.s32 1, %s543_s20 }
  0x18   : > { %p41_p5 = scmp.ge.s32.totalorder %s39_s26, 2  ;;  %p55_p6 = scmp.ne.s32.totalorder %s543_s20, %s539_s1 }
  0x19   : > { %p56_p7 = scmp.eq.s32.totalorder %s555_s23, 0  ;;  %p61_p8 = scmp.ne.s32.totalorder %s539_s1, %s535_s0 }
  0x1a   : > { %s777_s26 = smov (%p41_p5, %s39_s26), 0  ;;  %p62_p10 = scmp.eq.s32.totalorder %s332_s24, 0 }
  0x1b   : > { %p632_p9 = por %p56_p7, %p55_p6  ;;  %s43_s29 = ssub.s32 %s551_s22, %s777_s26 }
  0x1c   : > { %p87_p11 = scmp.eq.s32.totalorder %s332_s24, 1  ;;  %p46_p12 = scmp.eq.s32.totalorder %s43_s29, 0 }
  0x1d   : > { %p638_p13 = por %p62_p10, %p61_p8  ;;  %p93_p1 = scmp.eq.s32.totalorder %s333_s25, 1 }
  0x1e   : > { %p642_p0 = por %p87_p11, %p55_p6  ;;  %p369_p4 = scmp.lt.s32.totalorder %s555_s23, 2 }
  0x1f   : > { %s647_s5 = scalar_select %p46_p12, %s543_s20, %s48_s27  }
  0x20   : > { %p649_p2 = por %p93_p1, %p61_p8  ;;  %s113_s7 = sand.u32 1, %s543_s20  }
  0x21   : > { %s353_s8 = smul.u32 96, %s113_s7  ;;  %p659_p5 = pnand %p369_p4, %p632_p9 }
  0x22   : > { %s354_s9 = smul.u32 1536, %s551_s22  ;;  %p337_p6 = scmp.ge.s32.totalorder %s555_s23, 1 }
  0x23   : > { %s117_s14 = scalar_lea.vmem [#allocation5], %s353_s8  ;;  %s114_s16 = scalar_lea.sflag [#allocation6], %s113_s7 }
  0x24   : > { %s126_s13 = scalar_lea.hbm %s762_s2, %s354_s9  ;;  %s127_s15 = sshll.u32 %s117_s14, 4  ;;  %s128_s15 = int_to_ptr.vmem [resolvable:$true] %s127_s15 }
  0x25   : > { %p447_p7 = pneg %p659_p5  ;;  %s458_s17 = scalar_lea.vmem %s128_s15, 1536 }
  0x26   : > { %p459_p8 = scmp.ne.s32.totalorder %s128_s15, %s458_s17  ;;  %s559_s18 = smov [#allocation5]  }
  0x27   : > { %s463_s19 = sshll.u32 %s559_s18, 4  ;;  %s464_s19 = int_to_ptr.vmem [resolvable:$false] %s463_s19 }
  0x28   : > { %p461_p10 = pnand %p459_p8, %p447_p7  ;;  %s465_s24 = scalar_lea.vmem %s464_s19, 3072 }
  0x29   : > { %p466_p9 = scmp.lt.s32.totalorder %s128_s15, %s464_s19  ;;  %p467_p12 = scmp.lt.s32.totalorder %s465_s24, %s458_s17 }
  0x2a   : > { %p462_p11 = pneg %p461_p10 }
  0x2b   : > { %p468_p1 = por %p467_p12, %p466_p9 }
  0x2d   : > { %p469_p4 = pnand %p468_p1, %p462_p11 }
  0x2f   : > { %472 = shalt.err (!%p469_p4)
}
  0x30   : > { %s560_s25 = smov 768   ;;  %s561_s27 = smov 48  }
  0x31   : > { %364 = dma.hbm_to_vmem [thread:$0]  (!%p659_p5), %s126_s13, 1536, %s128_s15, %s114_s16, %s560_s25, %s560_s25, %s561_s27  }
  0x32   : > { %p135_p3 = scmp.lt.s32.totalorder %s555_s23, 3 }
  0x34   : > { %p136_p7 = pnand %p337_p6, %p135_p3 }
  0x35   : > { %s675_s28 = sand.u32 (!%p136_p7), 1, %s539_s1  }
  0x36   : > { %139 = sbr.rel (%p136_p7) target bundleno = 92 (0x5c), region = 24  ;;  %s142_s7 = scalar_lea.sflag (!%p136_p7), [#allocation6], %s675_s28 }
  0x37   : > { %s355_s29 = smul.u32 (!%p136_p7), 96, %s675_s28 }
  0x39   : > { %s681_s8 = scalar_lea.vmem (!%p136_p7), [#allocation5], %s355_s29 }
  0x3b   : > { %526 = dma.done.wait (%p638_p13), %s142_s7, 1536  }
  0x3c   : > { %528 = vsyncadd (%p638_p13), %s142_s7, 4294965760  ;;  %s170_s9 = sld [smem:[#allocation3]]  ;;  %v166_v0 = vld [vmem:[%s681_s8] sm:$0xff]  ;;  %v167_v2 = vld [vmem:[%s681_s8 + $0x8] sm:$0xff]  ;;  %s356_s30 = smul.u32 1536, %s547_s21 }
  0x3d   : > { %s176_s10 = sld [smem:[#allocation4]]  ;;  %v168_v3 = vld [vmem:[%s681_s8 + $0x30] sm:$0xff]  ;;  %v169_v8 = vld [vmem:[%s681_s8 + $0x38] sm:$0xff]  ;;  %v188_v13 = vld [vmem:[%s681_s8 + $0x40] sm:$0xff]  ;;  %s163_s15 = scalar_lea.vmem [#allocation8], %s355_s29 }
  0x3e   : > { %s338_s11 = sld [smem:[#allocation3 + $0x1]]  ;;  %v186_v9 = vld [vmem:[%s681_s8 + $0x10] sm:$0xff]  ;;  %v187_v10 = vld [vmem:[%s681_s8 + $0x18] sm:$0xff]  ;;  %v189_v14 = vld [vmem:[%s681_s8 + $0x48] sm:$0xff]  ;;  %s245_s16 = sshll.u32 %s163_s15, 4  ;;  %s713_s16 = int_to_ptr.vmem [resolvable:$true] %s245_s16 }
  0x3f   : > { %s339_s12 = sld [smem:[#allocation4 + $0x1]]  ;;  %v207_v19 = vld [vmem:[%s681_s8 + $0x20] sm:$0xff]  ;;  %v208_v20 = vld [vmem:[%s681_s8 + $0x28] sm:$0xff]  ;;  %v209_v25 = vld [vmem:[%s681_s8 + $0x50] sm:$0xff]  ;;  %s711_s18 = scalar_lea.hbm %s763_s3, %s356_s30 }
  0x40   : > { %s687_s13 = sld [smem:[#allocation3 + $0x2]]  ;;  %v210_v26 = vld [vmem:[%s681_s8 + $0x58] sm:$0xff]  ;;  %s229_s19 = scalar_lea.sflag [#allocation7], %s675_s28 }
  0x41   : > { %s689_s14 = sld [smem:[#allocation4 + $0x2]]  ;;  %s473_s24 = scalar_lea.vmem %s713_s16, 1536 }
  0x42   : > { %v171_v1 = vstv %s170_s9  ;;  %p474_p13 = scmp.ne.s32.totalorder %s713_s16, %s473_s24  ;;  %s562_s25 = smov [#allocation8]  }
  0x43   : > { %v172_v4 = vmul.f32 %v171_v1, %v166_v0  ;;  %v177_v5 = vstv %s176_s10  ;;  %v173_v6 = vmul.f32 %v171_v1, %v167_v2  ;;  %v174_v7 = vmul.f32 %v171_v1, %v168_v3  ;;  %s477_s27 = sshll.u32 %s562_s25, 4  ;;  %s478_s27 = int_to_ptr.vmem [resolvable:$false] %s477_s27 }
  0x44   : > { %v175_v11 = vmul.f32 %v171_v1, %v169_v8  ;;  %v191_v12 = vstv %s338_s11  ;;  %p475_p3 = pnand %p474_p13, %p642_p0  ;;  %s479_s29 = scalar_lea.vmem %s478_s27, 3072 }
  0x45   : > { %v178_v15 = vadd.f32 %v177_v5, %v172_v4  ;;  %v179_v16 = vadd.f32 %v177_v5, %v173_v6  ;;  %v180_v17 = vadd.f32 %v177_v5, %v174_v7  ;;  %v192_v18 = vmul.f32 %v191_v12, %v186_v9  ;;  %p480_p6 = scmp.lt.s32.totalorder %s713_s16, %s478_s27  ;;  %p481_p8 = scmp.lt.s32.totalorder %s479_s29, %s473_s24 }
  0x46   : > { %v181_v21 = vadd.f32 %v177_v5, %v175_v11  ;;  %v197_v22 = vstv %s339_s12  ;;  %v193_v23 = vmul.f32 %v191_v12, %v187_v10  ;;  %v194_v24 = vmul.f32 %v191_v12, %v188_v13  ;;  %p476_p5 = pneg %p475_p3 }
  0x47   : > { %182 = vst [vmem:[%s163_s15] sm:$0xff] %v178_v15  ;;  %183 = vst [vmem:[%s163_s15 + $0x8] sm:$0xff] %v179_v16  ;;  %v198_v27 = vadd.f32 %v197_v22, %v192_v18  ;;  %v195_v28 = vmul.f32 %v191_v12, %v189_v14  ;;  %v212_v29 = vstv %s687_s13  ;;  %v218_v30 = vstv %s689_s14  ;;  %p482_p10 = por %p481_p8, %p480_p6 }
  0x48   : > { %184 = vst [vmem:[%s163_s15 + $0x10] sm:$0xff] %v180_v17  ;;  %185 = vst [vmem:[%s163_s15 + $0x18] sm:$0xff] %v181_v21  ;;  %v199_v31 = vadd.f32 %v197_v22, %v193_v23  ;;  %v200_v32 = vadd.f32 %v197_v22, %v194_v24  ;;  %v213_v33 = vmul.f32 %v212_v29, %v207_v19 }
  0x49   : > { %v214_v34 = vmul.f32 %v212_v29, %v208_v20  ;;  %340 = vst [vmem:[%s163_s15 + $0x20] sm:$0xff] %v198_v27  ;;  %v201_v35 = vadd.f32 %v197_v22, %v195_v28  ;;  %v215_v36 = vmul.f32 %v212_v29, %v209_v25  ;;  %v216_v37 = vmul.f32 %v212_v29, %v210_v26  ;;  %p483_p11 = pnand %p482_p10, %p476_p5 }
  0x4a   : > { %341 = vst [vmem:[%s163_s15 + $0x28] sm:$0xff] %v199_v31  ;;  %342 = vst [vmem:[%s163_s15 + $0x30] sm:$0xff] %v200_v32  ;;  %v219_v38 = vadd.f32 %v218_v30, %v213_v33 }
  0x4b   : > { %v220_v39 = vadd.f32 %v218_v30, %v214_v34  ;;  %343 = vst [vmem:[%s163_s15 + $0x38] sm:$0xff] %v201_v35  ;;  %v221_v40 = vadd.f32 %v218_v30, %v215_v36  ;;  %v222_v41 = vadd.f32 %v218_v30, %v216_v37 }
  0x4c   : > { %346 = vst [vmem:[%s163_s15 + $0x40] sm:$0xff] %v219_v38 }
  0x4d   : > { %347 = vst [vmem:[%s163_s15 + $0x48] sm:$0xff] %v220_v39  ;;  %348 = vst [vmem:[%s163_s15 + $0x50] sm:$0xff] %v221_v40 }
  0x4e   : > { %349 = vst [vmem:[%s163_s15 + $0x58] sm:$0xff] %v222_v41 }
  0x4f   : > { %486 = shalt.err (!%p483_p11)
}
  0x50   : > { %s487_s7 = scalar_lea.hbm %s711_s18, 1536  ;;  %s491_s10 = scalar_lea.hbm %s763_s3, 3072 }
  0x51   : > { %p488_p9 = scmp.ne.s32.totalorder %s711_s18, %s487_s7  ;;  %p492_p4 = scmp.lt.s32.totalorder %s711_s18, %s763_s3 }
  0x52   : > { %p493_p7 = scmp.lt.s32.totalorder %s491_s10, %s487_s7 }
  0x53   : > { %p489_p12 = pnand %p488_p9, %p642_p0 }
  0x54   : > { %p494_p13 = por %p493_p7, %p492_p4 }
  0x55   : > { %p490_p1 = pneg %p489_p12 }
  0x57   : > { %p495_p3 = pnand %p494_p13, %p490_p1 }
  0x59   : > { %498 = shalt.err (!%p495_p3)
}
  0x5a   : > { %s563_s13 = smov 256   ;;  %s564_s14 = smov 16  }
  0x5b   : > { %359 = dma.vmem_to_hbm [thread:$0]  (%p642_p0), %s713_s16, 1536, %s711_s18, %s229_s19, %s563_s13, %s563_s13, %s564_s14  }
  0x5c PF: > { %s260_s30 = sand.u32 1, %s535_s0   ;;  %p770_p5 = scmp.ge.s32.totalorder %s555_s23, 2 }
  0x5d   : > { %s261_s15 = scalar_lea.sflag [#allocation7], %s260_s30 }
  0x5e   : > { %p366_p6 = pnand %p770_p5, %p649_p2 }
  0x60   : > { %p367_p8 = pneg %p366_p6 }
  0x62   : > { %530 = dma.done.wait (%p367_p8), %s261_s15, 1536  }
  0x63   : > { %532 = vsyncadd (%p367_p8), %s261_s15, 4294965760  ;;  %s27_s23 = sadd.s32 1, %s555_s23   ;;  %s771_s0 = smov %s539_s1 }
  0x64   : > { %p24_p10 = scmp.ge.s32.totalorder %s27_s23, 4   ;;  %s772_s1 = smov %s543_s20 }
  0x65   : > { %s773_s20 = smov %s647_s5  ;;  %s774_s21 = smov %s551_s22 }
  0x66   : > { %s775_s22 = smov %s777_s26  ;;  %26 = sbr.rel (!%p24_p10) target bundleno = 22 (0x16), region = 71 }
  0x6b   :  { %266 = vsyncpa [#allocation6], 1 }
  0x6c   :  { %268 = vsyncpa [#allocation6 + $0x1], 1 }
  0x6d   :  { %269 = vsyncpa [#allocation7], 1 }
  0x6e   :  { %271 = vsyncpa [#allocation7 + $0x1], 1 }

</bundles_post_ra>
